<compile_context>
chip_gen: v7x
topology: tpu7x:2x2x1
jax: 0.10.0
libtpu: 0.0.40
codegen_flags: <defaults>
</compile_context>

<pallas_src>
import functools
import math
import numpy as np

import jax
import jax.numpy as jnp
from jax import lax
from jax.experimental import pallas as pl
from jax.experimental.pallas import tpu as pltpu


# ----------------------------------------------------------------------------
# Generic tiled kernels
# ----------------------------------------------------------------------------
def _linear_kernel(x_ref, w_ref, b_ref, o_ref, *, act):
    y = jnp.dot(x_ref[...], w_ref[...], preferred_element_type=jnp.float32)
    y = y + b_ref[...]
    if act == "relu":
        y = jnp.maximum(y, 0.0)
    elif act == "gelu":
        y = jax.nn.gelu(y, approximate=False)   # torch nn.GELU default (erf)
    o_ref[...] = y


def linear(x, w, b2, act="none", row_tile=512):
    """act(x @ w + b), rows tiled so big M pipelines / shards across cores."""
    M, K = x.shape
    N = w.shape[1]
    rt = M if M <= row_tile else row_tile
    return pl.pallas_call(
        functools.partial(_linear_kernel, act=act),
        out_shape=jax.ShapeDtypeStruct((M, N), jnp.float32),
        grid=(pl.cdiv(M, rt),),
        in_specs=[pl.BlockSpec((rt, K), lambda i: (i, 0)),
                  pl.BlockSpec((K, N), lambda i: (0, 0)),
                  pl.BlockSpec((1, N), lambda i: (0, 0))],
        out_specs=pl.BlockSpec((rt, N), lambda i: (i, 0)),
        compiler_params=pltpu.CompilerParams(
            dimension_semantics=("parallel",)),
    )(x, w, b2)


def _matmul_kernel(x_ref, w_ref, o_ref):
    o_ref[...] = jnp.dot(x_ref[...], w_ref[...],
                         preferred_element_type=jnp.float32)


def matmul(x, w, row_tile=512):
    M, K = x.shape
    N = w.shape[1]
    rt = M if M <= row_tile else row_tile
    return pl.pallas_call(
        _matmul_kernel,
        out_shape=jax.ShapeDtypeStruct((M, N), jnp.float32),
        grid=(pl.cdiv(M, rt),),
        in_specs=[pl.BlockSpec((rt, K), lambda i: (i, 0)),
                  pl.BlockSpec((K, N), lambda i: (0, 0))],
        out_specs=pl.BlockSpec((rt, N), lambda i: (i, 0)),
        compiler_params=pltpu.CompilerParams(
            dimension_semantics=("parallel",)),
    )(x, w)


# ----------------------------------------------------------------------------
# GCN layer:  relu(A_norm @ (X W) + b)
# ----------------------------------------------------------------------------
def _gcn_fused_kernel(a_ref, x_ref, w_ref, b_ref, o_ref):
    xw = jnp.dot(x_ref[...], w_ref[...], preferred_element_type=jnp.float32)
    y = jnp.dot(a_ref[...], xw, preferred_element_type=jnp.float32) + b_ref[...]
    o_ref[...] = jnp.maximum(y, 0.0)


def _gcn_agg_kernel(a_ref, xw_ref, b_ref, o_ref):
    y = jnp.dot(a_ref[...], xw_ref[...],
                preferred_element_type=jnp.float32) + b_ref[...]
    o_ref[...] = jnp.maximum(y, 0.0)


def gcn_layer(adj, x, w, b2, row_tile=256):
    N = adj.shape[0]
    K = x.shape[1]
    H = w.shape[1]
    if N <= row_tile:
        # whole graph fits VMEM comfortably: one fused launch.
        return pl.pallas_call(
            _gcn_fused_kernel,
            out_shape=jax.ShapeDtypeStruct((N, H), jnp.float32),
            grid=(1,),
            in_specs=[pl.BlockSpec((N, N), lambda i: (0, 0)),
                      pl.BlockSpec((N, K), lambda i: (0, 0)),
                      pl.BlockSpec((K, H), lambda i: (0, 0)),
                      pl.BlockSpec((1, H), lambda i: (0, 0))],
            out_specs=pl.BlockSpec((N, H), lambda i: (0, 0)),
        )(adj, x, w, b2)
    # Large graphs: X W once, then row-tile the dense aggregation so only a
    # (row_tile, N) strip of A is VMEM-resident per grid step (v7x 64 MiB safe).
    xw = matmul(x, w, row_tile=row_tile)
    return pl.pallas_call(
        _gcn_agg_kernel,
        out_shape=jax.ShapeDtypeStruct((N, H), jnp.float32),
        grid=(pl.cdiv(N, row_tile),),
        in_specs=[pl.BlockSpec((row_tile, N), lambda i: (i, 0)),
                  pl.BlockSpec((N, H), lambda i: (0, 0)),
                  pl.BlockSpec((1, H), lambda i: (0, 0))],
        out_specs=pl.BlockSpec((row_tile, H), lambda i: (i, 0)),
        compiler_params=pltpu.CompilerParams(
            dimension_semantics=("parallel",)),
    )(adj, xw, b2)


# ----------------------------------------------------------------------------
# Fused RetNet layer kernel (one launch per layer, grid over graphs)
# ----------------------------------------------------------------------------
def _retnet_layer_kernel(x_ref, wqkvg_ref, wo_ref,
                         ln1g_ref, ln1b_ref, ln2g_ref, ln2b_ref,
                         w1_ref, b1_ref, w2_ref, b2_ref, o_ref,
                         *, heads, hidden, vdim, gammas, eps):
    x = x_ref[0]                                     # (S, H)
    S = x.shape[0]
    hd = hidden // heads
    hvd = vdim // heads

    def ln(z, g, b):
        mu = jnp.mean(z, axis=-1, keepdims=True)
        var = jnp.mean((z - mu) ** 2, axis=-1, keepdims=True)
        return (z - mu) * lax.rsqrt(var + eps) * g + b

    xn = ln(x, ln1g_ref[...], ln1b_ref[...])

    # fused Q/K/V/G projection: one MXU contraction, sliced in-kernel
    qkvg = jnp.dot(xn, wqkvg_ref[...], preferred_element_type=jnp.float32)
    q = qkvg[:, :hidden]
    k = qkvg[:, hidden:2 * hidden]
    v = qkvg[:, 2 * hidden:2 * hidden + vdim]
    g = qkvg[:, 2 * hidden + vdim:]

    # causal decay mask generated in-kernel (no (heads,S,S) HBM tensor).
    # The exponent is masked BEFORE exp so long sequences never produce inf.
    n_idx = lax.broadcasted_iota(jnp.float32, (S, S), 0)
    m_idx = lax.broadcasted_iota(jnp.float32, (S, S), 1)
    causal = n_idx >= m_idx
    diff_c = jnp.where(causal, n_idx - m_idx, 0.0)   # >= 0 everywhere
    causal_f = causal.astype(jnp.float32)

    # TODO(synk): XPOS rotary Q/K scaling of the reference RetNet submodule is
    # omitted (its source was not provided); plain Q/K projections are used.
    ys = []
    for h in range(heads):
        lg = math.log(gammas[h])                     # static per-head scalar
        dmask = jnp.exp(diff_c * lg) * causal_f
        qh = q[:, h * hd:(h + 1) * hd]
        kh = k[:, h * hd:(h + 1) * hd]
        vh = v[:, h * hvd:(h + 1) * hvd]
        att = lax.dot_general(qh, kh, (((1,), (1,)), ((), ())),
                              preferred_element_type=jnp.float32) * dmask
        ret = jnp.dot(att, vh, preferred_element_type=jnp.float32)
        # GroupNorm(heads, v_dim, affine=False): per-token stats over this
        # head's channels.
        mu = jnp.mean(ret, axis=-1, keepdims=True)
        var = jnp.mean((ret - mu) ** 2, axis=-1, keepdims=True)
        ys.append((ret - mu) * lax.rsqrt(var + eps))
    y = jnp.concatenate(ys, axis=-1)                 # (S, V) concat of heads

    gate = g * jax.nn.sigmoid(g)                     # swish(X W_G)
    msr = jnp.dot(gate * y, wo_ref[...], preferred_element_type=jnp.float32)
    y1 = msr + x                                     # residual 1

    y1n = ln(y1, ln2g_ref[...], ln2b_ref[...])
    h1 = jax.nn.gelu(
        jnp.dot(y1n, w1_ref[...], preferred_element_type=jnp.float32)
        + b1_ref[...], approximate=False)
    ffn = jnp.dot(h1, w2_ref[...], preferred_element_type=jnp.float32) + b2_ref[...]
    o_ref[0] = ffn + y1                              # residual 2


def retnet_forward(x_bsh, layer_params, gammas):
    B, S, H = x_bsh.shape
    for lp in layer_params:
        V = lp["WO"].shape[0]
        F = lp["ffn_w1"].shape[1]
        x_bsh = pl.pallas_call(
            functools.partial(_retnet_layer_kernel, heads=lp["heads"],
                              hidden=H, vdim=V, gammas=gammas, eps=1e-5),
            out_shape=jax.ShapeDtypeStruct((B, S, H), jnp.float32),
            grid=(B,),
            in_specs=[pl.BlockSpec((1, S, H), lambda b: (b, 0, 0)),
                      pl.BlockSpec((H, 2 * H + 2 * V), lambda b: (0, 0)),
                      pl.BlockSpec((V, H), lambda b: (0, 0)),
                      pl.BlockSpec((1, H), lambda b: (0, 0)),
                      pl.BlockSpec((1, H), lambda b: (0, 0)),
                      pl.BlockSpec((1, H), lambda b: (0, 0)),
                      pl.BlockSpec((1, H), lambda b: (0, 0)),
                      pl.BlockSpec((H, F), lambda b: (0, 0)),
                      pl.BlockSpec((1, F), lambda b: (0, 0)),
                      pl.BlockSpec((F, H), lambda b: (0, 0)),
                      pl.BlockSpec((1, H), lambda b: (0, 0))],
            out_specs=pl.BlockSpec((1, S, H), lambda b: (b, 0, 0)),
            compiler_params=pltpu.CompilerParams(
                dimension_semantics=("parallel",)),
        )(x_bsh, lp["W_qkvg"], lp["WO"],
          lp["ln1_g"], lp["ln1_b"], lp["ln2_g"], lp["ln2_b"],
          lp["ffn_w1"], lp["ffn_b1"], lp["ffn_w2"], lp["ffn_b2"])
    return x_bsh


# ----------------------------------------------------------------------------
# Fused classifier head (max-pool, lin2(concat), lin3, lin4, log_softmax)
# ----------------------------------------------------------------------------
def _head_kernel(seq_ref, news_ref, w2a_ref, w2b_ref, b2_ref,
                 w3_ref, b3_ref, w4_ref, b4_ref, o_ref):
    # Max over the padded sequence dim — matches the PyTorch reference, which
    # also max-pools over padded positions.
    pooled = jnp.max(seq_ref[...], axis=1)                       # (bt, H)
    news = news_ref[...]
    # lin2(concat([news, pooled])) == news @ W2a + pooled @ W2b
    h = (jnp.dot(news, w2a_ref[...], preferred_element_type=jnp.float32)
         + jnp.dot(pooled, w2b_ref[...], preferred_element_type=jnp.float32)
         + b2_ref[...])
    h = jnp.maximum(h, 0.0)
    h = jnp.maximum(jnp.dot(h, w3_ref[...], preferred_element_type=jnp.float32)
                    + b3_ref[...], 0.0)
    logits = jnp.dot(h, w4_ref[...], preferred_element_type=jnp.float32) + b4_ref[...]
    m = jnp.max(logits, axis=-1, keepdims=True)
    z = logits - m
    o_ref[...] = z - jnp.log(jnp.sum(jnp.exp(z), axis=-1, keepdims=True))


def head(seq, news, params, batch_tile=64):
    B, S, H = seq.shape
    Hd2 = params["lin3_w"].shape[1]
    out_dim = params["lin4_w"].shape[1]
    bt = B if B <= batch_tile else batch_tile
    return pl.pallas_call(
        _head_kernel,
        out_shape=jax.ShapeDtypeStruct((B, out_dim), jnp.float32),
        grid=(pl.cdiv(B, bt),),
        in_specs=[pl.BlockSpec((bt, S, H), lambda i: (i, 0, 0)),
                  pl.BlockSpec((bt, H), lambda i: (i, 0)),
                  pl.BlockSpec((H, H), lambda i: (0, 0)),
                  pl.BlockSpec((H, H), lambda i: (0, 0)),
                  pl.BlockSpec((1, H), lambda i: (0, 0)),
                  pl.BlockSpec((H, Hd2), lambda i: (0, 0)),
                  pl.BlockSpec((1, Hd2), lambda i: (0, 0)),
                  pl.BlockSpec((Hd2, out_dim), lambda i: (0, 0)),
                  pl.BlockSpec((1, out_dim), lambda i: (0, 0))],
        out_specs=pl.BlockSpec((bt, out_dim), lambda i: (i, 0)),
        compiler_params=pltpu.CompilerParams(
            dimension_semantics=("parallel",)),
    )(seq, news, params["lin2_wa"], params["lin2_wb"], params["lin2_b"],
      params["lin3_w"], params["lin3_b"], params["lin4_w"], params["lin4_b"])


# ----------------------------------------------------------------------------
# Host-side glue (data-dependent index manipulation)
# ----------------------------------------------------------------------------
def dynamic_edge_index_np(edge_index, root, total_num, t, T):
    # TODO(synk): data-dependent edge slicing / unique / pad_sequence have no
    # clean static-shape Pallas equivalent; done host-side with numpy.
    root_ext = np.concatenate([root, [total_num + 1]])
    src = edge_index[0]
    edge_batch = ((src[:, None] >= root_ext[None, :-1]) &
                  (src[:, None] < root_ext[None, 1:])).nonzero()[1]
    start = np.flatnonzero(edge_batch[1:] - edge_batch[:-1])
    start = np.concatenate([[0], start + 1])
    _, num = np.unique(edge_batch, return_counts=True)
    s = start + np.floor(num * t / T).astype(np.int64)
    e = start + np.floor(num * (t + 1) / T).astype(np.int64)
    return [edge_index[:, s[i]:e[i]] for i in range(num.shape[0])]


def gcn_norm_adj(edge_index, num_nodes):
    src = np.concatenate([edge_index[0], np.arange(num_nodes)])
    dst = np.concatenate([edge_index[1], np.arange(num_nodes)])
    deg = np.zeros(num_nodes, np.float64)
    np.add.at(deg, dst, 1.0)
    dinv = np.where(deg > 0, 1.0 / np.sqrt(np.maximum(deg, 1e-12)), 0.0)
    norm = dinv[src] * dinv[dst]
    A = np.zeros((num_nodes, num_nodes), np.float32)
    np.add.at(A, (dst, src), norm.astype(np.float32))   # out[i] += A[i,j] x[j]
    return A


# ----------------------------------------------------------------------------
# Parameter init (kernel-ready layouts) + full forward
# ----------------------------------------------------------------------------
def init_params(key, input_dim, hidden_dim, fnn_dim, out_dim, heads,
                retnet_layers, gcn_layers, double_v_dim=False):
    v_dim = hidden_dim * 2 if double_v_dim else hidden_dim
    keys = iter(jax.random.split(key, 64))

    def rnd(shape, scale):
        return jax.random.normal(next(keys), shape, jnp.float32) * scale

    gammas = tuple(float(g) for g in
                   (1.0 - np.exp(np.linspace(np.log(1 / 32),
                                             np.log(1 / 512), heads))))
    p = {"heads": heads, "gammas": gammas}
    p["lin1_w"] = rnd((input_dim, hidden_dim), 1 / np.sqrt(input_dim))
    p["lin1_b"] = rnd((1, hidden_dim), 0.02)
    p["gcn"] = [(rnd((input_dim, hidden_dim), 1 / np.sqrt(input_dim)),
                 jnp.zeros((1, hidden_dim), jnp.float32))
                for _ in range(gcn_layers)]
    layers = []
    for _ in range(retnet_layers):
        wq = rnd((hidden_dim, hidden_dim), 1 / np.sqrt(hidden_dim))
        wk = rnd((hidden_dim, hidden_dim), 1 / np.sqrt(hidden_dim))
        wv = rnd((hidden_dim, v_dim), 1 / np.sqrt(hidden_dim))
        wg = rnd((hidden_dim, v_dim), 1 / np.sqrt(hidden_dim))
        layers.append({
            "heads": heads,
            "W_qkvg": jnp.concatenate([wq, wk, wv, wg], axis=1),   # (H, 2H+2V)
            "WO": rnd((v_dim, hidden_dim), 1 / np.sqrt(v_dim)),
            "ln1_g": jnp.ones((1, hidden_dim), jnp.float32),
            "ln1_b": jnp.zeros((1, hidden_dim), jnp.float32),
            "ln2_g": jnp.ones((1, hidden_dim), jnp.float32),
            "ln2_b": jnp.zeros((1, hidden_dim), jnp.float32),
            "ffn_w1": rnd((hidden_dim, fnn_dim), 1 / np.sqrt(hidden_dim)),
            "ffn_b1": jnp.zeros((1, fnn_dim), jnp.float32),
            "ffn_w2": rnd((fnn_dim, hidden_dim), 1 / np.sqrt(fnn_dim)),
            "ffn_b2": jnp.zeros((1, hidden_dim), jnp.float32),
        })
    p["retnet"] = layers
    lin2_w = rnd((hidden_dim * 2, hidden_dim), 1 / np.sqrt(hidden_dim * 2))
    p["lin2_wa"] = lin2_w[:hidden_dim]      # news part of concat
    p["lin2_wb"] = lin2_w[hidden_dim:]      # pooled part of concat
    p["lin2_b"] = rnd((1, hidden_dim), 0.02)
    p["lin3_w"] = rnd((hidden_dim, hidden_dim // 2), 1 / np.sqrt(hidden_dim))
    p["lin3_b"] = rnd((1, hidden_dim // 2), 0.02)
    p["lin4_w"] = rnd((hidden_dim // 2, out_dim), 1 / np.sqrt(hidden_dim // 2))
    p["lin4_b"] = rnd((1, out_dim), 0.02)
    return p


def rgt_forward(params, x, edge_index_np, batch_np, t, T):
    N = x.shape[0]

    # root node of each graph
    root = np.flatnonzero(batch_np[1:] - batch_np[:-1])
    root = np.concatenate([[0], root + 1]).astype(np.int32)

    # news = lin1(x[root])
    news = linear(x[jnp.asarray(root)], params["lin1_w"], params["lin1_b"])

    # dynamic per-graph edge slices for time step t
    ei_list = dynamic_edge_index_np(edge_index_np, root, N, t, T)
    ei_all = np.concatenate(ei_list, axis=-1)

    # GCN layers on all selected edges (dense normalized adjacency)
    A = jnp.asarray(gcn_norm_adj(ei_all, N))
    xh = x
    for (w, b2) in params["gcn"]:
        xh = gcn_layer(A, xh, w, b2)

    # per-graph unique nodes -> padded sequences via one vectorized gather
    seqs = [np.unique(ei) for ei in ei_list]
    B = len(seqs)
    S = max(int(len(s)) for s in seqs)
    idx = np.zeros((B, S), np.int32)
    mask = np.zeros((B, S, 1), np.float32)
    for g, s in enumerate(seqs):
        idx[g, :len(s)] = s.astype(np.int32)
        mask[g, :len(s), 0] = 1.0
    x_pad = jnp.take(xh, jnp.asarray(idx), axis=0) * jnp.asarray(mask)

    # RetNet over padded sequences (one fused kernel per layer)
    x_seq = retnet_forward(x_pad, params["retnet"], params["gammas"])

    # pooled + concat head + log_softmax (fused kernel)
    return head(x_seq, news, params)


# ----------------------------------------------------------------------------
# Demo
# ----------------------------------------------------------------------------
if __name__ == "__main__":
    input_dim, hidden_dim, fnn_dim, out_dim = 8, 16, 32, 4
    heads, retnet_layers, gcn_layers, T_fold = 2, 2, 1, 5
    t_step = 1

    key = jax.random.PRNGKey(0)
    k_x, k_e0s, k_e0d, k_e1s, k_e1d, k_par = jax.random.split(key, 6)

    # Two graphs: nodes 0..9 (graph 0) and 10..21 (graph 1)
    n0, n1 = 10, 12
    N = n0 + n1
    x = jax.random.normal(k_x, (N, input_dim), jnp.float32)
    batch = np.array([0] * n0 + [1] * n1, np.int64)

    e_per_graph = 20
    e0_src = np.asarray(jax.random.randint(k_e0s, (e_per_graph,), 0, n0))
    e0_dst = np.asarray(jax.random.randint(k_e0d, (e_per_graph,), 0, n0))
    e1_src = np.asarray(jax.random.randint(k_e1s, (e_per_graph,), n0, N))
    e1_dst = np.asarray(jax.random.randint(k_e1d, (e_per_graph,), n0, N))
    edge_index = np.stack([np.concatenate([e0_src, e1_src]),
                           np.concatenate([e0_dst, e1_dst])]).astype(np.int64)

    params = init_params(k_par, input_dim, hidden_dim, fnn_dim, out_dim,
                         heads, retnet_layers, gcn_layers, double_v_dim=False)

    out = rgt_forward(params, x, edge_index, batch, t_step, T_fold)
    jax.block_until_ready(out)
    assert out.shape == (2, out_dim)
    print("KERNEL_OK")
</pallas_src>

<mosaic_0001>
module attributes {stable_mosaic.version = 11 : i64} {
  func.func @_linear_kernel(%arg0: i32, %arg1: memref<2x8xf32, #tpu.memory_space<vmem>>, %arg2: memref<8x16xf32, #tpu.memory_space<vmem>>, %arg3: memref<1x16xf32, #tpu.memory_space<vmem>>, %arg4: memref<2x16xf32, #tpu.memory_space<vmem>>) attributes {dimension_semantics = [#tpu.dimension_semantics<parallel>], iteration_bounds = array<i64: 1>, scalar_prefetch = 0 : i64, scratch_operands = 0 : i64, tpu.core_type = #tpu.core_type<tc>, window_params = [{transform_indices = @transform_0, window_bounds = array<i64: 2, 8>}, {pipeline_mode = #tpu.pipeline_mode<synchronous>, transform_indices = @transform_1, window_bounds = array<i64: 8, 16>}, {pipeline_mode = #tpu.pipeline_mode<synchronous>, transform_indices = @transform_2, window_bounds = array<i64: 1, 16>}, {transform_indices = @transform_3, window_bounds = array<i64: 2, 16>}]} {
    %c0 = arith.constant 0 : index
    %c0_0 = arith.constant 0 : index
    %0 = vector.load %arg1[%c0, %c0_0] : memref<2x8xf32, #tpu.memory_space<vmem>>, vector<2x8xf32>
    %c0_1 = arith.constant 0 : index
    %c0_2 = arith.constant 0 : index
    %1 = vector.load %arg2[%c0_1, %c0_2] : memref<8x16xf32, #tpu.memory_space<vmem>>, vector<8x16xf32>
    %cst = arith.constant dense<0.000000e+00> : vector<2x16xf32>
    %2 = tpu.matmul %0, %1, %cst {dimension_numbers = #tpu.dot_dimension_numbers<[1], [0], [0], [1], [0, 0, 1, 1], [], []>} : vector<2x8xf32>, vector<8x16xf32>, vector<2x16xf32> -> vector<2x16xf32>
    %c0_3 = arith.constant 0 : index
    %c0_4 = arith.constant 0 : index
    %3 = vector.load %arg3[%c0_3, %c0_4] : memref<1x16xf32, #tpu.memory_space<vmem>>, vector<1x16xf32>
    %4 = vector.broadcast %3 : vector<1x16xf32> to vector<2x16xf32>
    %5 = arith.addf %2, %4 : vector<2x16xf32>
    %c0_5 = arith.constant 0 : index
    %c0_6 = arith.constant 0 : index
    %6 = vector.load %arg4[%c0_5, %c0_6] : memref<2x16xf32, #tpu.memory_space<vmem>>, vector<2x16xf32>
    tpu.vector_store %arg4[%c0_5, %c0_6], %5 {strides = array<i32>} : memref<2x16xf32, #tpu.memory_space<vmem>>, vector<2x16xf32>,
    return
  }
  func.func @transform_0(%arg0: i32) -> (i32, i32) {
    %c0_i32 = arith.constant 0 : i32
    %c0_i32_0 = arith.constant 0 : i32
    return %arg0, %c0_i32 : i32, i32
  }
  func.func @transform_1(%arg0: i32) -> (i32, i32) {
    %c0_i32 = arith.constant 0 : i32
    %c0_i32_0 = arith.constant 0 : i32
    %c0_i32_1 = arith.constant 0 : i32
    return %c0_i32, %c0_i32_0 : i32, i32
  }
  func.func @transform_2(%arg0: i32) -> (i32, i32) {
    %c0_i32 = arith.constant 0 : i32
    %c0_i32_0 = arith.constant 0 : i32
    %c0_i32_1 = arith.constant 0 : i32
    return %c0_i32, %c0_i32_0 : i32, i32
  }
  func.func @transform_3(%arg0: i32) -> (i32, i32) {
    %c0_i32 = arith.constant 0 : i32
    %c0_i32_0 = arith.constant 0 : i32
    return %arg0, %c0_i32 : i32, i32
  }
}

</mosaic_0001>

<bundles_post_ra>
// kernel: tpu_custom_call.1
= control target key start
LH: loop header
LB: loop body
LE: loop exit
PB: predicated region body
PF: predicated region fallthrough
CT: control target
= control target key end

     0   :  { %8 = vsyncpa [#allocation3], 0  ;;  %s290_s0 = inlined_call_operand.hbm [shape: f32[2,8], index: 0, kind: input, shape index: {}]   ;;  %s291_s1 = inlined_call_operand.hbm [shape: f32[8,16], index: 1, kind: input, shape index: {}]   ;;  %s292_s2 = inlined_call_operand.vmem [shape: f32[1,16], index: 2, kind: input, shape index: {}]   ;;  %s293_s3 = inlined_call_operand.hbm [shape: f32[2,16], index: 3, kind: output, shape index: {}]  }
   0x1   :  { %9 = vsyncpa [#allocation6], 0 }
   0x2   :  { %10 = vsyncpa [#allocation4], 0  ;;  %s226_s12 = smov [#allocation2]   ;;  %s227_s14 = smov [#allocation5]  }
   0x3   :  { %s17_s13 = sshll.u32 %s226_s12, 4  ;;  %s27_s15 = sshll.u32 %s227_s14, 4  ;;  %s18_s13 = int_to_ptr.vmem [resolvable:$true] %s17_s13  ;;  %s28_s15 = int_to_ptr.vmem [resolvable:$true] %s27_s15 }
   0x4   :  { %s154_s18 = scalar_lea.hbm %s290_s0, 32 }
   0x5   :  { %p155_p0 = scmp.ne.s32.totalorder %s290_s0, %s154_s18  ;;  %p158_p1 = scmp.lt.u32.totalorder %s154_s18, %s290_s0 }
   0x7   :  { %p160_p2 = pnand %p158_p1, %p155_p0 }
   0x9   :  { %163 = shalt.err (!%p160_p2)
}
   0xa   :  { %s164_s23 = scalar_lea.vmem %s18_s13, 32  ;;  %p169_p4 = scmp.lt.s32.totalorder %s18_s13, %s18_s13 }
   0xb   :  { %p165_p3 = scmp.ne.s32.totalorder %s18_s13, %s164_s23  ;;  %p170_p5 = scmp.lt.s32.totalorder %s164_s23, %s164_s23 }
   0xd   :  { %p171_p6 = por %p170_p5, %p169_p4 }
   0xf   :  { %p172_p7 = pnand %p171_p6, %p165_p3 }
  0x11   :  { %175 = shalt.err (!%p172_p7)
}
  0x12   :  { %20 = dma.hbm_to_vmem [thread:$0]  %s290_s0, 32, %s18_s13, [#allocation3]  }
  0x13   :  { %s176_s28 = scalar_lea.hbm %s291_s1, 128 }
  0x14   :  { %p177_p8 = scmp.ne.s32.totalorder %s291_s1, %s176_s28  ;;  %p180_p9 = scmp.lt.u32.totalorder %s176_s28, %s291_s1 }
  0x16   :  { %p182_p10 = pnand %p180_p9, %p177_p8 }
  0x18   :  { %185 = shalt.err (!%p182_p10)
}
  0x19   :  { %s186_s6 = scalar_lea.vmem %s28_s15, 128  ;;  %p191_p12 = scmp.lt.s32.totalorder %s28_s15, %s28_s15 }
  0x1a   :  { %p187_p11 = scmp.ne.s32.totalorder %s28_s15, %s186_s6  ;;  %p192_p13 = scmp.lt.s32.totalorder %s186_s6, %s186_s6 }
  0x1c   :  { %p193_p0 = por %p192_p13, %p191_p12 }
  0x1e   :  { %p194_p1 = pnand %p193_p0, %p187_p11 }
  0x20   :  { %197 = shalt.err (!%p194_p1)
}
  0x21   :  { %30 = dma.hbm_to_vmem [thread:$0]  %s291_s1, 128, %s28_s15, [#allocation6]  }
  0x22   :  { %220 = dma.done.wait [#allocation3], 32  }
  0x23   :  { %221 = vsyncadd [#allocation3], 4294967264 }
  0x24   :  { %222 = dma.done.wait [#allocation6], 128  }
  0x25   :  { %223 = vsyncadd [#allocation6], 4294967168  ;;  %v228_v0 = vmov 0.0   ;;  %vm229_vm0 = vmmov 0   ;;  %vm48_vm1 = vcmask 64512   ;;  %v40_v1 = vld [vmem:[#allocation5] sm:$0xff] }
  0x26   :  { %144 = vmatprep.subr.mxu0 %v228_v0  ;;  %146 = vmatprep.mubr.msk.f32.mxu0 %vm229_vm0, %v228_v0  ;;  %v39_v2 = vld [vmem:[#allocation2] sm:$0x3]  ;;  %s230_s10 = smov [#allocation7]   ;;  %vm122_vm2 = vcmask 123904  }
  0x27   :  { %145 = vmatpush3.msra.mxu0 %v40_v1  ;;  %v140_v3 = vld [vmem:[%s292_s2] ss:$0 sm:$0xff]  ;;  %s130_s11 = sshll.u32 %s230_s10, 4  ;;  %s131_s11 = int_to_ptr.vmem [resolvable:$true] %s130_s11 }
  0x28   :  { %147 = vmatmul.mubr.msk.f32.vlgmr.msra.gmra.mrb[0].mxu0 %vm48_vm1, %v39_v2  ;;  %s198_s1 = scalar_lea.vmem %s131_s11, 32  ;;  %p203_p3 = scmp.lt.s32.totalorder %s131_s11, %s131_s11 }
  0x29   :  { %p199_p2 = scmp.ne.s32.totalorder %s131_s11, %s198_s1  ;;  %p204_p4 = scmp.lt.s32.totalorder %s198_s1, %s198_s1 }
  0x2b   :  { %p205_p5 = por %p204_p4, %p203_p3 }
  0x2d   :  { %p206_p6 = pnand %p205_p5, %p199_p2 }
  0xfb   :  { %v118_v4 = vpop.f32.mrb[0].mxu0 }
  0xfc   :  { %v119_v5 = vadd.f32 %v140_v3, %v118_v4  ;;  %v148_v6 = vpop.f32.mrb[1].mxu0 }
  0xfe   :  { %123 = vst.msk [vmem:[#allocation7] sm:$0x3] %vm122_vm2, %v119_v5 }
  0xff   :  { %209 = shalt.err (!%p206_p6)
}
 0x100   :  { %s210_s14 = scalar_lea.hbm %s293_s3, 32 }
 0x101   :  { %p211_p7 = scmp.ne.s32.totalorder %s293_s3, %s210_s14  ;;  %p214_p8 = scmp.lt.u32.totalorder %s210_s14, %s293_s3 }
 0x103   :  { %p216_p9 = pnand %p214_p8, %p211_p7 }
 0x105   :  { %219 = shalt.err (!%p216_p9)
}
 0x106   :  { %133 = dma.vmem_to_hbm [thread:$0]  %s131_s11, 32, %s293_s3, [#allocation4]  }
 0x107   :  { %224 = dma.done.wait [#allocation4], 32  }
 0x108   :  { %225 = vsyncadd [#allocation4], 4294967264 }
 0x109   :  { %137 = vsyncpa [#allocation3], 1 }
 0x10a   :  { %138 = vsyncpa [#allocation6], 1 }
 0x10b   :  { %139 = vsyncpa [#allocation4], 1 }

</bundles_post_ra>
